<compile_context>
chip_gen: v5e
topology: v5e:2x2
jax: 0.10.0
libtpu: 0.0.40
codegen_flags: <defaults>
</compile_context>

<pallas_src>
import functools
import math

import jax
import jax.numpy as jnp
from jax import lax
from jax.experimental import pallas as pl
from jax.experimental.pallas import tpu as pltpu

KERNEL_SIZE = 3                        # Conv1d kernel size, "same" padding


# ----------------------------------------------------------------------------
# Hardware-aware budgets
# ----------------------------------------------------------------------------
def _hw_budgets():
    """(per-buffer block budget, vmem_limit_bytes), generation-aware."""
    try:
        vmem = int(pltpu.get_tpu_info().vmem_capacity_bytes)
    except Exception:                          # conservative default: v7x-class
        vmem = 64 * 1024 * 1024
    if vmem >= 96 * 1024 * 1024:               # v5e / v6e: 128 MiB VMEM
        return 14 * 1024 * 1024, 96 * 1024 * 1024
    return 8 * 1024 * 1024, 48 * 1024 * 1024   # v7x-class: 64 MiB VMEM


def _sublane(itemsize):
    """Native sublane tile for the dtype: 8 (f32), 16 (bf16), 32 (int8/fp8)."""
    return max(8, 32 // max(1, itemsize))


# ----------------------------------------------------------------------------
# Tile-size selection helpers (tiles divide their axis exactly, so the (8,128)
# last-two-dims rule holds either via multiples or full extents).
# ----------------------------------------------------------------------------
def _pick_nb(N, slab_bytes, budget_bytes, *, min_grid=2):
    """Pack batch rows per block; keep >= min_grid grid steps for megacore."""
    cap = max(1, min(N, budget_bytes // max(1, slab_bytes)))
    if N >= min_grid:
        cap = min(cap, N // min_grid)          # keep the 2nd TensorCore busy
    cap = max(1, cap)
    for nb in range(cap, 0, -1):
        if N % nb == 0:
            return nb
    return 1


def _pick_tc(C, L, itemsize, block_bytes):
    """Channel tile for pass 1: a sublane-tile multiple dividing C (or full C)."""
    sub = _sublane(itemsize)
    if C % sub != 0:
        # TODO(synk): pad C to a sublane multiple (or masked tail) so the byte
        # budget is honored for unaligned channel counts.
        return C
    best, tc = sub, sub
    while tc <= C:
        if C % tc == 0 and tc * L * itemsize <= block_bytes:
            best = tc
        tc += sub
    return best


def _pick_tl(L, C, itemsize, block_bytes):
    """Lane tile for pass 2: byte budget drives the cap (no fixed max_tl)."""
    cap = max(128, block_bytes // max(1, C * itemsize))
    if L <= cap or L % 128 != 0:
        # TODO(synk): cdiv grid + masked tail for lane-unaligned large L.
        return L
    best, tl = 128, 128
    while tl <= cap:
        if L % tl == 0:
            best = tl
        tl += 128
    return best


def _fused_nb(N, C, L, itemsize, vmem_limit_bytes):
    """Largest NB (dividing N, megacore-capped) whose fused block fits VMEM."""
    slab = C * L * itemsize          # one batch row of x (native dtype)
    f32_slab = C * L * 4             # worst case: f32 sum-accumulation transient
    f32_rows = 8 * L * 4 * 4         # small padded f32 rows inside the kernel
    budget = int(vmem_limit_bytes * 0.85)

    def fits(nb):
        # in + out double-buffered, plus in-kernel f32 transients.
        return nb * (4 * slab + f32_slab + f32_rows) <= budget

    if not fits(1):
        return None
    cap = N if N < 2 else max(1, N // 2)       # keep >= 2 grid steps (megacore)
    best = 1
    for nb in range(1, cap + 1):
        if N % nb == 0 and fits(nb):
            best = nb
    return best


# ----------------------------------------------------------------------------
# Shared: 3-tap zero-padded "same" conv over the last axis of 2-D f32 rows.
# The mean's 1/C is folded into the avg-row taps (inv_c).
# ----------------------------------------------------------------------------
def _conv_same_2d(s_sum, s_max, w_ref, inv_c):
    K = w_ref.shape[-1]
    pad = (K - 1) // 2
    L = s_sum.shape[-1]
    idx = lax.broadcasted_iota(jnp.int32, s_sum.shape, s_sum.ndim - 1)
    acc = jnp.zeros_like(s_sum)
    for k in range(K):
        off = k - pad
        if off == 0:                            # center tap: no roll / mask
            a_sh, m_sh = s_sum, s_max
        else:
            valid = (idx + off >= 0) & (idx + off < L)
            a_sh = jnp.where(valid, jnp.roll(s_sum, -off, axis=-1), 0.0)
            m_sh = jnp.where(valid, jnp.roll(s_max, -off, axis=-1), 0.0)
        acc = acc + (w_ref[0, k] * inv_c) * a_sh + w_ref[1, k] * m_sh
    return acc


# ----------------------------------------------------------------------------
# Fused single-pass kernel: reductions + conv + modulate in one grid step.
# x is read once and written once (~2x |x| HBM traffic total).
# ----------------------------------------------------------------------------
def _fused_kernel(x_ref, w_ref, o_ref, *, num_channels):
    # x_ref / o_ref: (NB, C, L) native dtype; w_ref: (2, K) f32 in SMEM.
    x = x_ref[...]
    s_sum = jnp.sum(x, axis=1, dtype=jnp.float32)       # f32 accumulation
    s_max = jnp.max(x, axis=1).astype(jnp.float32)      # exact in native dtype
    m = _conv_same_2d(s_sum, s_max, w_ref, 1.0 / float(num_channels))
    m = m.astype(o_ref.dtype)[:, None, :]                # (NB, 1, L)
    o_ref[...] = (x * m).astype(o_ref.dtype)             # broadcast over C


# ----------------------------------------------------------------------------
# Fallback pass 1: channel sum/max accumulated over C tiles + conv
#                  -> (N, 1, L) f32 attention map.
# Relies on the C axis being the innermost ("arbitrary", last) grid axis.
# ----------------------------------------------------------------------------
def _attn_map_kernel(x_ref, w_ref, map_ref, sum_ref, max_ref, *, num_channels):
    # x_ref: (NB, TC, L); map_ref: (NB, 1, L) f32; sum_ref/max_ref: (NB, L) f32
    tc = pl.program_id(1)

    x = x_ref[...]
    part_sum = jnp.sum(x, axis=1, dtype=jnp.float32)     # (NB, L)
    part_max = jnp.max(x, axis=1)                        # (NB, L) native dtype

    @pl.when(tc == 0)
    def _init():
        sum_ref[...] = jnp.zeros(sum_ref.shape, jnp.float32)
        max_ref[...] = jnp.full(max_ref.shape, -jnp.inf, dtype=jnp.float32)

    sum_ref[...] = sum_ref[...] + part_sum
    max_ref[...] = jnp.maximum(max_ref[...], part_max.astype(jnp.float32))

    @pl.when(tc == pl.num_programs(1) - 1)
    def _finalize():
        acc = _conv_same_2d(sum_ref[...], max_ref[...], w_ref,
                            1.0 / float(num_channels))
        map_ref[...] = acc[:, None, :].astype(map_ref.dtype)


# ----------------------------------------------------------------------------
# Fallback pass 2: stream x lane-densely, multiply by the broadcast map.
# Kept a pure load-mul-store (friendly to v5e's single vst slot / no-bf16 VPU).
# ----------------------------------------------------------------------------
def _modulate_kernel(map_ref, x_ref, o_ref):
    # map_ref: (NB, 1, TL) f32; x_ref / o_ref: (NB, C, TL) native dtype
    m = map_ref[...].astype(x_ref.dtype)                  # no f32 copy of x
    o_ref[...] = (x_ref[...] * m).astype(o_ref.dtype)


# ----------------------------------------------------------------------------
# Wrapper
# ----------------------------------------------------------------------------
def spatial_forward(x, w, *,
                    x_block_bytes=None,
                    vmem_limit_bytes=None,
                    allow_fused=True):
    """x: (N, C, L); w: (2, K) squeezed Conv1d(2,1,K,bias=False) weight (f32)."""
    N, C, L = x.shape
    itemsize = jnp.dtype(x.dtype).itemsize
    default_block, default_vmem = _hw_budgets()
    if x_block_bytes is None:
        x_block_bytes = default_block
    if vmem_limit_bytes is None:
        vmem_limit_bytes = default_vmem

    # ---------------- fused single-pass path (common case) -----------------
    if allow_fused:
        nb = _fused_nb(N, C, L, itemsize, vmem_limit_bytes)
        if nb is not None:
            cost = pl.CostEstimate(
                flops=int(3 * N * C * L + 6 * KERNEL_SIZE * N * L),
                transcendentals=0,
                bytes_accessed=int(2 * N * C * L * itemsize))
            return pl.pallas_call(
                functools.partial(_fused_kernel, num_channels=C),
                out_shape=jax.ShapeDtypeStruct((N, C, L), x.dtype),
                grid_spec=pltpu.PrefetchScalarGridSpec(
                    num_scalar_prefetch=0,
                    grid=(N // nb,),
                    in_specs=[
                        pl.BlockSpec((nb, C, L), lambda b: (b, 0, 0)),
                        pl.BlockSpec(memory_space=pltpu.MemorySpace.SMEM),
                    ],
                    out_specs=pl.BlockSpec((nb, C, L), lambda b: (b, 0, 0)),
                ),
                compiler_params=pltpu.CompilerParams(
                    dimension_semantics=("parallel",),
                    vmem_limit_bytes=vmem_limit_bytes),
                cost_estimate=cost,
            )(x, w)

    # ---------------- two-pass fallback (huge per-batch slabs) --------------
    # Pass 1: (N, 1, L) f32 attention map, C tiled and accumulated.
    TC = _pick_tc(C, L, itemsize, x_block_bytes)
    NB1 = _pick_nb(N, TC * L * itemsize, x_block_bytes)
    grid1 = (N // NB1, C // TC)

    cost1 = pl.CostEstimate(
        flops=int(2 * N * C * L + 6 * KERNEL_SIZE * N * L),
        transcendentals=0,
        bytes_accessed=int(N * C * L * itemsize + N * L * 4))

    attn_map = pl.pallas_call(
        functools.partial(_attn_map_kernel, num_channels=C),
        out_shape=jax.ShapeDtypeStruct((N, 1, L), jnp.float32),
        grid_spec=pltpu.PrefetchScalarGridSpec(
            num_scalar_prefetch=0,
            grid=grid1,
            in_specs=[
                pl.BlockSpec((NB1, TC, L), lambda b, c: (b, c, 0)),
                pl.BlockSpec(memory_space=pltpu.MemorySpace.SMEM),
            ],
            out_specs=pl.BlockSpec((NB1, 1, L), lambda b, c: (b, 0, 0)),
            scratch_shapes=[
                pltpu.VMEM((NB1, L), jnp.float32),   # running channel sum
                pltpu.VMEM((NB1, L), jnp.float32),   # running channel max
            ],
        ),
        compiler_params=pltpu.CompilerParams(
            dimension_semantics=("parallel", "arbitrary"),
            vmem_limit_bytes=vmem_limit_bytes),
        cost_estimate=cost1,
    )(x, w)

    # Pass 2: lane-dense modulate of x (TL driven purely by the byte budget).
    TL = _pick_tl(L, C, itemsize, x_block_bytes)
    NB2 = _pick_nb(N, C * TL * itemsize, x_block_bytes)
    grid2 = (N // NB2, L // TL)

    cost2 = pl.CostEstimate(
        flops=int(N * C * L),
        transcendentals=0,
        bytes_accessed=int(2 * N * C * L * itemsize + N * L * 4))

    out = pl.pallas_call(
        _modulate_kernel,
        out_shape=jax.ShapeDtypeStruct((N, C, L), x.dtype),
        grid_spec=pltpu.PrefetchScalarGridSpec(
            num_scalar_prefetch=0,
            grid=grid2,
            in_specs=[
                pl.BlockSpec((NB2, 1, TL), lambda b, j: (b, 0, j)),
                pl.BlockSpec((NB2, C, TL), lambda b, j: (b, 0, j)),
            ],
            out_specs=pl.BlockSpec((NB2, C, TL), lambda b, j: (b, 0, j)),
        ),
        compiler_params=pltpu.CompilerParams(
            dimension_semantics=("parallel", "parallel"),
            vmem_limit_bytes=vmem_limit_bytes),
        cost_estimate=cost2,
    )(attn_map, x)
    return out


# ----------------------------------------------------------------------------
# Pure-JAX reference mirroring the PyTorch forward (no sigmoid, as in forward()).
# ----------------------------------------------------------------------------
def spatial_reference(x, w):
    avg = jnp.mean(x, axis=1, keepdims=True)
    mx = jnp.max(x, axis=1, keepdims=True)
    cat = jnp.concatenate([avg, mx], axis=1)                 # (N, 2, L)
    rhs = w.reshape(1, 2, KERNEL_SIZE)                       # (O=1, I=2, K)
    pad = (KERNEL_SIZE - 1) // 2
    conv = lax.conv_general_dilated(
        cat, rhs, window_strides=(1,), padding=[(pad, pad)],
        dimension_numbers=("NCH", "OIH", "NCH"))             # (N, 1, L)
    return conv * x


if __name__ == "__main__":
    key = jax.random.PRNGKey(0)
    kx, kw, kx2 = jax.random.split(key, 3)

    # Deterministic Conv1d(2, 1, K, bias=False) weight (kaiming-uniform bound).
    fan_in = 2 * KERNEL_SIZE
    bound = 1.0 / math.sqrt(fan_in)
    w = jax.random.uniform(kw, (2, KERNEL_SIZE), dtype=jnp.float32,
                           minval=-bound, maxval=bound)

    # --- small module-scale smoke test (f32) -> fused single-pass path ------
    N, C, L = 2, 4, 16
    x = jax.random.normal(kx, (N, C, L), dtype=jnp.float32)
    out = jax.block_until_ready(spatial_forward(x, w))
    ref = spatial_reference(x, w)
    assert out.shape == (N, C, L) and out.dtype == x.dtype
    assert jnp.allclose(out, ref, atol=1e-5, rtol=1e-5), "f32 mismatch vs reference"

    # --- larger lane-dense bf16 case -> fused path with NB batch packing ----
    N2, C2, L2 = 4, 32, 1024
    x2 = jax.random.normal(kx2, (N2, C2, L2),
                           dtype=jnp.float32).astype(jnp.bfloat16)
    out2 = jax.block_until_ready(spatial_forward(x2, w))
    ref2 = spatial_reference(x2.astype(jnp.float32), w)
    assert out2.dtype == jnp.bfloat16
    assert jnp.allclose(out2.astype(jnp.float32), ref2, atol=2e-2, rtol=5e-2), \
        "bf16 (fused) mismatch vs reference"

    # --- same bf16 case forced down the tiled two-pass fallback -------------
    #     (small block budget => TC=16 with 2 C-steps, TL=256 with 4 L-steps)
    out3 = jax.block_until_ready(
        spatial_forward(x2, w, allow_fused=False, x_block_bytes=16 * 1024))
    assert jnp.allclose(out3.astype(jnp.float32), ref2, atol=2e-2, rtol=5e-2), \
        "bf16 (two-pass) mismatch vs reference"

    print("KERNEL_OK")
</pallas_src>

<mosaic_0001>
module attributes {stable_mosaic.version = 11 : i64} {
  func.func @_fused_kernel(%arg0: i32, %arg1: memref<1x4x16xf32, #tpu.memory_space<vmem>>, %arg2: memref<2x3xf32, #tpu.memory_space<smem>>, %arg3: memref<1x4x16xf32, #tpu.memory_space<vmem>>) attributes {dimension_semantics = [#tpu.dimension_semantics<parallel>], iteration_bounds = array<i64: 2>, scalar_prefetch = 0 : i64, scratch_operands = 0 : i64, tpu.core_type = #tpu.core_type<tc>, window_params = [{transform_indices = @transform_0, window_bounds = array<i64: 1, 4, 16>}, {transform_indices = @transform_1, window_bounds = array<i64: 2, 3>}, {transform_indices = @transform_2, window_bounds = array<i64: 1, 4, 16>}]} {
    %c0 = arith.constant 0 : index
    %c0_0 = arith.constant 0 : index
    %c0_1 = arith.constant 0 : index
    %0 = vector.load %arg1[%c0, %c0_0, %c0_1] : memref<1x4x16xf32, #tpu.memory_space<vmem>>, vector<1x4x16xf32>
    %cst = arith.constant dense<0.000000e+00> : vector<1x16xf32>
    %1 = vector.multi_reduction <add>, %0, %cst [1] : vector<1x4x16xf32> to vector<1x16xf32>
    %cst_2 = arith.constant dense<0xFF800000> : vector<1x16xf32>
    %2 = vector.multi_reduction <maximumf>, %0, %cst_2 [1] : vector<1x4x16xf32> to vector<1x16xf32>
    %3 = tpu.iota {dimensions = array<i32: 1>} : vector<1x16xi32>
    %cst_3 = arith.constant 0.000000e+00 : f32
    %4 = vector.broadcast %cst_3 : f32 to vector<1x16xf32>
    %c-1_i32 = arith.constant -1 : i32
    %5 = vector.broadcast %c-1_i32 : i32 to vector<1x16xi32>
    %6 = arith.addi %3, %5 : vector<1x16xi32>
    %c0_i32 = arith.constant 0 : i32
    %7 = vector.broadcast %c0_i32 : i32 to vector<1x16xi32>
    %8 = arith.cmpi sge, %6, %7 : vector<1x16xi32>
    %c-1_i32_4 = arith.constant -1 : i32
    %9 = vector.broadcast %c-1_i32_4 : i32 to vector<1x16xi32>
    %10 = arith.addi %3, %9 : vector<1x16xi32>
    %c16_i32 = arith.constant 16 : i32
    %11 = vector.broadcast %c16_i32 : i32 to vector<1x16xi32>
    %12 = arith.cmpi slt, %10, %11 : vector<1x16xi32>
    %13 = arith.andi %8, %12 : vector<1x16xi1>
    %14 = vector.extract_strided_slice %1 {offsets = [0, 15], sizes = [1, 1], strides = [1, 1]} : vector<1x16xf32> to vector<1x1xf32>
    %15 = vector.extract_strided_slice %1 {offsets = [0, 0], sizes = [1, 15], strides = [1, 1]} : vector<1x16xf32> to vector<1x15xf32>
    %16 = tpu.concatenate %14, %15 in 1 : vector<1x1xf32>, vector<1x15xf32> -> vector<1x16xf32>
    %cst_5 = arith.constant 0.000000e+00 : f32
    %17 = vector.broadcast %cst_5 : f32 to vector<1x16xf32>
    %18 = arith.select %13, %16, %17 : vector<1x16xi1>, vector<1x16xf32>
    %19 = vector.extract_strided_slice %2 {offsets = [0, 15], sizes = [1, 1], strides = [1, 1]} : vector<1x16xf32> to vector<1x1xf32>
    %20 = vector.extract_strided_slice %2 {offsets = [0, 0], sizes = [1, 15], strides = [1, 1]} : vector<1x16xf32> to vector<1x15xf32>
    %21 = tpu.concatenate %19, %20 in 1 : vector<1x1xf32>, vector<1x15xf32> -> vector<1x16xf32>
    %cst_6 = arith.constant 0.000000e+00 : f32
    %22 = vector.broadcast %cst_6 : f32 to vector<1x16xf32>
    %23 = arith.select %13, %21, %22 : vector<1x16xi1>, vector<1x16xf32>
    %c0_7 = arith.constant 0 : index
    %c0_8 = arith.constant 0 : index
    %24 = memref.load %arg2[%c0_7, %c0_8] : memref<2x3xf32, #tpu.memory_space<smem>>
    %cst_9 = arith.constant 2.500000e-01 : f32
    %25 = arith.mulf %24, %cst_9 : f32
    %26 = vector.broadcast %25 : f32 to vector<1x16xf32>
    %27 = arith.mulf %26, %18 : vector<1x16xf32>
    %28 = arith.addf %4, %27 : vector<1x16xf32>
    %c1 = arith.constant 1 : index
    %c0_10 = arith.constant 0 : index
    %29 = memref.load %arg2[%c1, %c0_10] : memref<2x3xf32, #tpu.memory_space<smem>>
    %30 = vector.broadcast %29 : f32 to vector<1x16xf32>
    %31 = arith.mulf %30, %23 : vector<1x16xf32>
    %32 = arith.addf %28, %31 : vector<1x16xf32>
    %c0_11 = arith.constant 0 : index
    %c1_12 = arith.constant 1 : index
    %33 = memref.load %arg2[%c0_11, %c1_12] : memref<2x3xf32, #tpu.memory_space<smem>>
    %cst_13 = arith.constant 2.500000e-01 : f32
    %34 = arith.mulf %33, %cst_13 : f32
    %35 = vector.broadcast %34 : f32 to vector<1x16xf32>
    %36 = arith.mulf %35, %1 : vector<1x16xf32>
    %37 = arith.addf %32, %36 : vector<1x16xf32>
    %c1_14 = arith.constant 1 : index
    %c1_15 = arith.constant 1 : index
    %38 = memref.load %arg2[%c1_14, %c1_15] : memref<2x3xf32, #tpu.memory_space<smem>>
    %39 = vector.broadcast %38 : f32 to vector<1x16xf32>
    %40 = arith.mulf %39, %2 : vector<1x16xf32>
    %41 = arith.addf %37, %40 : vector<1x16xf32>
    %c1_i32 = arith.constant 1 : i32
    %42 = vector.broadcast %c1_i32 : i32 to vector<1x16xi32>
    %43 = arith.addi %3, %42 : vector<1x16xi32>
    %c0_i32_16 = arith.constant 0 : i32
    %44 = vector.broadcast %c0_i32_16 : i32 to vector<1x16xi32>
    %45 = arith.cmpi sge, %43, %44 : vector<1x16xi32>
    %c1_i32_17 = arith.constant 1 : i32
    %46 = vector.broadcast %c1_i32_17 : i32 to vector<1x16xi32>
    %47 = arith.addi %3, %46 : vector<1x16xi32>
    %c16_i32_18 = arith.constant 16 : i32
    %48 = vector.broadcast %c16_i32_18 : i32 to vector<1x16xi32>
    %49 = arith.cmpi slt, %47, %48 : vector<1x16xi32>
    %50 = arith.andi %45, %49 : vector<1x16xi1>
    %51 = vector.extract_strided_slice %1 {offsets = [0, 1], sizes = [1, 15], strides = [1, 1]} : vector<1x16xf32> to vector<1x15xf32>
    %52 = vector.extract_strided_slice %1 {offsets = [0, 0], sizes = [1, 1], strides = [1, 1]} : vector<1x16xf32> to vector<1x1xf32>
    %53 = tpu.concatenate %51, %52 in 1 : vector<1x15xf32>, vector<1x1xf32> -> vector<1x16xf32>
    %cst_19 = arith.constant 0.000000e+00 : f32
    %54 = vector.broadcast %cst_19 : f32 to vector<1x16xf32>
    %55 = arith.select %50, %53, %54 : vector<1x16xi1>, vector<1x16xf32>
    %56 = vector.extract_strided_slice %2 {offsets = [0, 1], sizes = [1, 15], strides = [1, 1]} : vector<1x16xf32> to vector<1x15xf32>
    %57 = vector.extract_strided_slice %2 {offsets = [0, 0], sizes = [1, 1], strides = [1, 1]} : vector<1x16xf32> to vector<1x1xf32>
    %58 = tpu.concatenate %56, %57 in 1 : vector<1x15xf32>, vector<1x1xf32> -> vector<1x16xf32>
    %cst_20 = arith.constant 0.000000e+00 : f32
    %59 = vector.broadcast %cst_20 : f32 to vector<1x16xf32>
    %60 = arith.select %50, %58, %59 : vector<1x16xi1>, vector<1x16xf32>
    %c0_21 = arith.constant 0 : index
    %c2 = arith.constant 2 : index
    %61 = memref.load %arg2[%c0_21, %c2] : memref<2x3xf32, #tpu.memory_space<smem>>
    %cst_22 = arith.constant 2.500000e-01 : f32
    %62 = arith.mulf %61, %cst_22 : f32
    %63 = vector.broadcast %62 : f32 to vector<1x16xf32>
    %64 = arith.mulf %63, %55 : vector<1x16xf32>
    %65 = arith.addf %41, %64 : vector<1x16xf32>
    %c1_23 = arith.constant 1 : index
    %c2_24 = arith.constant 2 : index
    %66 = memref.load %arg2[%c1_23, %c2_24] : memref<2x3xf32, #tpu.memory_space<smem>>
    %67 = vector.broadcast %66 : f32 to vector<1x16xf32>
    %68 = arith.mulf %67, %60 : vector<1x16xf32>
    %69 = arith.addf %65, %68 : vector<1x16xf32>
    %70 = vector.shape_cast %69 : vector<1x16xf32> to vector<1x1x16xf32>
    %71 = vector.broadcast %70 : vector<1x1x16xf32> to vector<1x4x16xf32>
    %72 = arith.mulf %0, %71 : vector<1x4x16xf32>
    %c0_25 = arith.constant 0 : index
    %c0_26 = arith.constant 0 : index
    %c0_27 = arith.constant 0 : index
    %73 = vector.load %arg3[%c0_25, %c0_26, %c0_27] : memref<1x4x16xf32, #tpu.memory_space<vmem>>, vector<1x4x16xf32>
    tpu.vector_store %arg3[%c0_25, %c0_26, %c0_27], %72 {strides = array<i32>} : memref<1x4x16xf32, #tpu.memory_space<vmem>>, vector<1x4x16xf32>,
    return
  }
  func.func @transform_0(%arg0: i32) -> (i32, i32, i32) {
    %c0_i32 = arith.constant 0 : i32
    %c0_i32_0 = arith.constant 0 : i32
    %c0_i32_1 = arith.constant 0 : i32
    return %arg0, %c0_i32, %c0_i32_0 : i32, i32, i32
  }
  func.func @transform_1(%arg0: i32) -> (i32, i32) {
    %c0_i32 = arith.constant 0 : i32
    %c0_i32_0 = arith.constant 0 : i32
    %c0_i32_1 = arith.constant 0 : i32
    return %c0_i32, %c0_i32_0 : i32, i32
  }
  func.func @transform_2(%arg0: i32) -> (i32, i32, i32) {
    %c0_i32 = arith.constant 0 : i32
    %c0_i32_0 = arith.constant 0 : i32
    %c0_i32_1 = arith.constant 0 : i32
    return %arg0, %c0_i32, %c0_i32_0 : i32, i32, i32
  }
}

</mosaic_0001>

<bundles_post_ra>
// kernel: tpu_custom_call.1
= control target key start
LH: loop header
LB: loop body
LE: loop exit
PB: predicated region body
PF: predicated region fallthrough
CT: control target
= control target key end

     0   :  { %7 = vsyncpa [#allocation3], 0  ;;  %s747_s0 = inlined_call_operand.hbm [shape: f32[2,4,16], index: 0, kind: input, shape index: {}]   ;;  %s748_s1 = inlined_call_operand.hbm [shape: f32[2,3], index: 1, kind: input, shape index: {}]   ;;  %s749_s2 = inlined_call_operand.hbm [shape: f32[2,4,16], index: 2, kind: output, shape index: {}]  }
   0x1   :  { %9 = vsyncpa [#allocation3 + $0x1], 0 }
   0x2   :  { %10 = vsyncpa [#allocation5], 0 }
   0x3   :  { %11 = vsyncpa [#allocation4], 0 }
   0x4   :  { %13 = vsyncpa [#allocation4 + $0x1], 0  ;;  %s582_s9 = smov 0   ;;  %s584_s10 = smov 0  }
   0x5   :  { %s586_s11 = smov 0   ;;  %s588_s12 = smov 0  }
   0x6 LB: > { %s603_s13 = sadd.s32 4294967295, %s560_s12   ;;  %s365_s14 = sadd.s32 4294967294, %s560_s12   ;;  %s560_s12 = sphi %s588_s12, %s761_s12   ;;  %s556_s11 = sphi %s586_s11, %s760_s11   ;;  %s552_s10 = sphi %s584_s10, %s759_s10   ;;  %s548_s9 = sphi %s582_s9, %s758_s9  }
   0x7   : > { %p39_p0 = scmp.ne.s32.totalorder %s552_s10, %s548_s9  ;;  %p40_p1 = scmp.eq.s32.totalorder %s603_s13, 0 }
   0x8   : > { %p84_p2 = scmp.eq.s32.totalorder %s603_s13, 1  ;;  %p90_p3 = scmp.eq.s32.totalorder %s365_s14, 1 }
   0x9   : > { %p612_p4 = por %p40_p1, %p39_p0  ;;  %p366_p5 = scmp.ge.s32.totalorder %s560_s12, 1 }
   0xa   : > { %p617_p6 = por %p90_p3, %p39_p0  ;;  %p97_p7 = scmp.lt.s32.totalorder %s560_s12, 3 }
   0xb   : > { %s109_s19 = sshll.u32 %s748_s1, 4  ;;  %s633_s21 = sadd.s32 1, %s560_s12   ;;  %s110_s19 = int_to_ptr.hbm [resolvable:$true] %s109_s19 }
   0xc   : > { %p625_p8 = pnand %p366_p5, %p97_p7  ;;  %s23_s22 = ssub.s32 %s560_s12, %s633_s21 }
   0xd   : > { %p24_p12 = scmp.eq.s32.totalorder %s23_s22, 0  ;;  %s26_s23 = sadd.s32 1, %s556_s11 }
   0xe   : > { %p392_p10 = pneg %p625_p8  ;;  %p33_p13 = scmp.ne.s32.totalorder %s556_s11, %s552_s10 }
   0xf   : > { %s562_s24 = smov [#allocation6]   ;;  %p34_p0 = scmp.eq.s32.totalorder %s560_s12, 0 }
  0x10   : > { %p393_p11 = pnand %p392_p10, %p40_p1  ;;  %p648_p3 = por %p84_p2, %p33_p13 }
  0x11   : > { %s643_s25 = scalar_select %p24_p12, %s556_s11, %s26_s23  }
  0x12   : > { %395 = dma.hbm_to_smem (!%p393_p11), %s110_s19, 32, %s562_s24, [#allocation5]  }
  0x13   : > { %s120_s27 = sand.u32 1, %s556_s11   ;;  %p35_p5 = por %p34_p0, %p33_p13 }
  0x14   : > { %p405_p7 = scmp.lt.s32.totalorder %s560_s12, 2  ;;  %s369_s28 = sshll.u32 %s120_s27, 2 }
  0x15   : > { %s370_s29 = sshll.u32 %s560_s12, 2  ;;  %s124_s6 = scalar_lea.vmem [#allocation2], %s369_s28 }
  0x16   : > { %s128_s4 = scalar_lea.hbm %s747_s0, %s370_s29  ;;  %s132_s7 = sshll.u32 %s124_s6, 4  ;;  %s133_s7 = int_to_ptr.vmem [resolvable:$true] %s132_s7 }
  0x17   : > { %s130_s5 = sshll.u32 %s128_s4, 4  ;;  %p658_p10 = pnand %p405_p7, %p35_p5  ;;  %s131_s5 = int_to_ptr.hbm [resolvable:$true] %s130_s5 }
  0x18   : > { %s121_s14 = scalar_lea.sflag [#allocation3], %s120_s27  ;;  %s460_s17 = sshra.s32 %s131_s5, 4  ;;  %s461_s17 = int_to_ptr.hbm [resolvable:$true] %s460_s17 }
  0x19   : > { %s462_s18 = scalar_lea.hbm %s461_s17, 4  ;;  %p464_p11 = pneg %p658_p10 }
  0x1a   : > { %p463_p2 = scmp.ne.s32.totalorder %s461_s17, %s462_s18  ;;  %s467_s23 = scalar_lea.hbm %s747_s0, 8 }
  0x1b   : > { %p468_p0 = scmp.lt.s32.totalorder %s461_s17, %s747_s0  ;;  %p469_p5 = scmp.lt.s32.totalorder %s467_s23, %s462_s18 }
  0x1c   : > { %p465_p12 = pnand %p464_p11, %p463_p2 }
  0x1d   : > { %p470_p7 = por %p469_p5, %p468_p0 }
  0x1e   : > { %p466_p13 = pneg %p465_p12 }
  0x20   : > { %p471_p9 = pnand %p470_p7, %p466_p13 }
  0x22   : > { %474 = shalt.err (!%p471_p9)
}
  0x23   : > { %399 = dma.hbm_to_vmem [thread:$0]  (!%p658_p10), %s131_s5, 64, %s133_s7, %s121_s14  }
  0x24   : > { %141 = sbr.rel (%p625_p8) target bundleno = 204 (0xcc), region = 28  ;;  %s675_s27 = sand.u32 (!%p625_p8), 1, %s552_s10  }
  0x25   : > { %s372_s29 = sshll.u32 (!%p625_p8), %s675_s27, 2  ;;  %s144_s30 = scalar_lea.sflag (!%p625_p8), [#allocation3], %s675_s27 }
  0x26   : > { %s147_s3 = scalar_lea.vmem (!%p625_p8), [#allocation2], %s372_s29 }
  0x29   : > { %535 = dma.done.wait (%p612_p4), %s144_s30, 64  }
  0x2a   : > { %537 = vsyncadd (%p612_p4), %s144_s30, 4294967232 }
  0x2b   : > { %539 = dma.done.wait (%p40_p1), [#allocation5], 32  }
  0x2c   : > { %541 = vsyncadd (%p40_p1), [#allocation5], 4294967264 }
  0x2d   : > { %158 = sfence }
  0x2e   : > { %v689_v0 = vld [vmem:[%s147_s3] sm:$0xf]  ;;  %vm176_vm0 = vcmask 125952   ;;  %s563_s15 = smov 113   ;;  %s564_s20 = smov 127   ;;  %v191_v15 = vlaneseq  ;;  %vm204_vm3 = vcmask 7168  }
  0x2f   : > { %v184_v1 = vsel %vm176_vm0, %v689_v0, -inf  ;;  %v177_v2 = vsel %vm176_vm0, %v689_v0, 0.0  ;;  %s565_s4 = smov 1   ;;  %s566_s5 = smov 15   ;;  %vm244_vm5 = vcmask 121856  }
  0x30   : > { %v185_v3 = vrot.slane %v184_v1, 4  ;;  %v178_v4 = vrot.slane %v177_v2, 4  ;;  %s216_s6 = sld [smem:[#allocation6]]  ;;  %v192_v16 = vand.u32 127, %v191_v15  ;;  %s381_s24 = sshll.u32 %s603_s13, 2 }
  0x31   : > { %s376_s7 = sld [smem:[#allocation6 + $0x1]]  ;;  %s278_s3 = scalar_lea.hbm %s749_s2, %s381_s24 }
  0x32   : > { %v186_v5 = vmax.f32 %v184_v1, %v185_v3  ;;  %v179_v6 = vadd.f32 %v178_v4, %v177_v2  ;;  %v193_v20 = vadd.s32 4294967295, %v192_v16  ;;  %s375_s8 = sld [smem:[#allocation6 + $0x80]]  ;;  %v234_v21 = vadd.s32 1, %v192_v16  ;;  %s268_s13 = scalar_lea.sflag [#allocation4], %s675_s27 }
  0x33   : > { %s695_s14 = sld [smem:[#allocation6 + $0x2]] }
  0x34   : > { %v187_v7 = vrot.slane %v186_v5, 2  ;;  %v180_v8 = vrot.slane %v179_v6, 2  ;;  %s377_s17 = sld [smem:[#allocation6 + $0x81]]  ;;  %vm194_vm1 = vcmp.ge.s32.totalorder %v193_v20, 0  ;;  %vm195_vm2 = vcmp.lt.s32.totalorder %v193_v20, 16 }
  0x35   : > { %vm697_vm4 = vmand %vm194_vm1, %vm195_vm2  ;;  %s379_s22 = sld [smem:[#allocation6 + $0x82]]  ;;  %vm236_vm6 = vcmp.lt.s32.totalorder %v234_v21, 16 }
  0x36   : > { %v188_v9 = vmax.f32 %v186_v5, %v187_v7  ;;  %v181_v10 = vadd.f32 %v180_v8, %v179_v6  ;;  %s217_s18 = smul.f32 0.25, %s216_s6 }
  0x37   : > { %s226_s19 = smul.f32 0.25, %s376_s7 }
  0x38   : > { %v189_v11 = vrot.slane %v188_v9, 1  ;;  %v182_v12 = vrot.slane %v181_v10, 1  ;;  %v222_v24 = vstv %s375_s8  ;;  %v218_v26 = vstv %s217_s18 }
  0x39   : > { %v227_v27 = vstv %s226_s19  ;;  %s256_s23 = smul.f32 0.25, %s695_s14 }
  0x3a   : > { %v190_v13 = vmax.f32 %v188_v9, %v189_v11  ;;  %v183_v14 = vadd.f32 %v182_v12, %v181_v10  ;;  %v231_v33 = vstv %s377_s17 }
  0x3b   : > { %v257_v40 = vstv %s256_s23  ;;  %v261_v44 = vstv %s379_s22 }
  0x3c   : > { %208 = vrot.lane.b32.xlu1 %v190_v13, %s563_s15  ;;  %198 = vrot.lane.b32.xlu0 %v183_v14, %s563_s15  ;;  %v228_v37 = vmul.f32 %v227_v27, %v183_v14  ;;  %v232_v39 = vmul.f32 %v231_v33, %v190_v13  ;;  %s174_s15 = scalar_lea.vmem [#allocation7], %s372_s29  ;;  %s510_s29 = scalar_lea.hbm %s749_s2, 8 }
  0x3d   : > { %238 = vrot.lane.b32.xlu2 %v183_v14, %s564_s20 }
  0x44   : > { %211 = vrot.lane.b32.xlu1 %v190_v13, %s565_s4  ;;  %201 = vrot.lane.b32.xlu0 %v183_v14, %s565_s4  ;;  %s282_s4 = sshll.u32 %s278_s3, 4  ;;  %s283_s4 = int_to_ptr.hbm [resolvable:$true] %s282_s4 }
  0x45   : > { %241 = vrot.lane.b32.xlu2 %v183_v14, %s566_s5 }
  0x4c   : > { %250 = vrot.lane.b32.xlu1 %v190_v13, %s566_s5  ;;  %247 = vrot.lane.b32.xlu0 %v190_v13, %s564_s20  ;;  %s280_s20 = sshll.u32 %s174_s15, 4  ;;  %s504_s5 = sshra.s32 %s283_s4, 4  ;;  %s281_s20 = int_to_ptr.vmem [resolvable:$true] %s280_s20  ;;  %s505_s5 = int_to_ptr.hbm [resolvable:$true] %s504_s5 }
  0x4d   : > { %s506_s6 = scalar_lea.hbm %s505_s5, 4  ;;  %p511_p9 = scmp.lt.s32.totalorder %s505_s5, %s749_s2 }
  0x4e   : > { %p507_p1 = scmp.ne.s32.totalorder %s505_s5, %s506_s6  ;;  %p512_p10 = scmp.lt.s32.totalorder %s510_s29, %s506_s6 }
  0x50   : > { %p508_p4 = pnand %p507_p1, %p648_p3  ;;  %p513_p2 = por %p512_p10, %p511_p9 }
  0x52   : > { %p509_p8 = pneg %p508_p4 }
  0x54   : > { %p514_p11 = pnand %p513_p2, %p509_p8 }
  0x97   : > { %v239_v17 = vpop.permute.xlu2 %238 }
  0x9f   : > { %v242_v22 = vpop.permute.xlu2 %241 }
  0xa0   : > { %v245_v34 = vsel %vm244_vm5, %v239_v17, %v242_v22 }
  0xa1   : > { %v246_v41 = vsel %vm236_vm6, %v245_v34, 0.0 }
  0xa2   : > { %v258_v46 = vmul.f32 %v257_v40, %v246_v41 }
  0xae   : > { %v209_v18 = vpop.permute.xlu1 %208  ;;  %v199_v19 = vpop.permute.xlu0 %198 }
  0xb6   : > { %v212_v25 = vpop.permute.xlu1 %211  ;;  %v202_v28 = vpop.permute.xlu0 %201 }
  0xb7   : > { %v214_v29 = vsel %vm204_vm3, %v209_v18, %v212_v25  ;;  %v205_v30 = vsel %vm204_vm3, %v199_v19, %v202_v28 }
  0xb8   : > { %v215_v31 = vsel %vm697_vm4, %v214_v29, 0.0  ;;  %v206_v32 = vsel %vm697_vm4, %v205_v30, 0.0 }
  0xb9   : > { %v223_v35 = vmul.f32 %v222_v24, %v215_v31  ;;  %v219_v36 = vmul.f32 %v218_v26, %v206_v32 }
  0xbb   : > { %v224_v38 = vadd.f32 %v223_v35, %v219_v36 }
  0xbd   : > { %v229_v42 = vadd.f32 %v228_v37, %v224_v38 }
  0xbe   : > { %v251_v43 = vpop.permute.xlu1 %250  ;;  %v248_v45 = vpop.permute.xlu0 %247 }
  0xbf   : > { %v233_v47 = vadd.f32 %v232_v39, %v229_v42  ;;  %v253_v48 = vsel %vm244_vm5, %v248_v45, %v251_v43 }
  0xc0   : > { %v254_v49 = vsel %vm236_vm6, %v253_v48, 0.0 }
  0xc1   : > { %v259_v50 = vadd.f32 %v258_v46, %v233_v47  ;;  %v262_v51 = vmul.f32 %v261_v44, %v254_v49 }
  0xc3   : > { %v263_v52 = vadd.f32 %v262_v51, %v259_v50 }
  0xc5   : > { %v264_v53 = vperm.slane %v263_v52, 0 }
  0xc7   : > { %v265_v54 = vmul.f32 %v264_v53, %v689_v0 }
  0xc9   : > { %266 = vst.msk [vmem:[%s174_s15] sm:$0xf] %vm176_vm0, %v265_v54 }
  0xca   : > { %517 = shalt.err (!%p514_p11)
}
  0xcb   : > { %390 = dma.vmem_to_hbm [thread:$0]  (%p648_p3), %s281_s20, 64, %s283_s4, %s268_s13  }
  0xcc PF: > { %s294_s27 = sand.u32 1, %s548_s9   ;;  %p757_p12 = scmp.ge.s32.totalorder %s560_s12, 2 }
  0xcd   : > { %s295_s18 = scalar_lea.sflag [#allocation4], %s294_s27 }
  0xce   : > { %p401_p13 = pnand %p757_p12, %p617_p6 }
  0xd0   : > { %p402_p0 = pneg %p401_p13 }
  0xd2   : > { %543 = dma.done.wait (%p402_p0), %s295_s18, 64  }
  0xd3   : > { %545 = vsyncadd (%p402_p0), %s295_s18, 4294967232  ;;  %p16_p5 = scmp.ge.s32.totalorder %s633_s21, 4   ;;  %s758_s9 = smov %s552_s10 }
  0xd4   : > { %s759_s10 = smov %s556_s11  ;;  %s760_s11 = smov %s643_s25 }
  0xd5   : > { %s761_s12 = smov %s633_s21  ;;  %18 = sbr.rel (!%p16_p5) target bundleno = 6 (0x6), region = 78 }
  0xda   :  { %301 = vsyncpa [#allocation3], 1 }
  0xdb   :  { %303 = vsyncpa [#allocation3 + $0x1], 1 }
  0xdc   :  { %304 = vsyncpa [#allocation4], 1 }
  0xdd   :  { %306 = vsyncpa [#allocation4 + $0x1], 1 }
  0xde   :  { %307 = vsyncpa [#allocation5], 1 }
  0xdf   :  { %309 = vsyncpa [#allocation5 + $0x1], 1 }

</bundles_post_ra>
